<compile_context>
chip_gen: v7x
topology: tpu7x:2x2x1
jax: 0.10.0
libtpu: 0.0.40
codegen_flags: <defaults>
</compile_context>

<pallas_src>
import functools

import jax
import jax.numpy as jnp
from jax.experimental import pallas as pl
from jax.experimental.pallas import tpu as pltpu


def _round_up(n, m):
    return ((n + m - 1) // m) * m


def _residual_sigmoid_kernel(x_ref, w1t_ref, b1_ref, w2t_ref, b2_ref, o_ref, *,
                             weight_2):
    # x_ref: (tr, Fp) packed rows; w*t_ref: (Fp, Fp) folded + block-diagonal
    # weights (already contain omega_0 / weight_3); b*_ref: (1, Fp) folded
    # biases.  Matmul operands use the weight dtype (f32 default, bf16 opt-in),
    # accumulation is always f32.
    mm_dtype = w1t_ref.dtype
    x = x_ref[...].astype(jnp.float32)

    z1 = jnp.dot(x.astype(mm_dtype), w1t_ref[...],
                 preferred_element_type=jnp.float32) + b1_ref[...]
    s1 = 0.5 * (jnp.tanh(0.5 * z1) + 1.0)          # exact sigmoid, EUP tanh

    z2 = jnp.dot(s1.astype(mm_dtype), w2t_ref[...],
                 preferred_element_type=jnp.float32) + b2_ref[...]
    s2 = 0.5 * (jnp.tanh(0.5 * z2) + 1.0)

    out = x + s2
    if weight_2 != 1.0:                             # trace-time: skip VALU mul
        out = weight_2 * out
    o_ref[...] = out.astype(o_ref.dtype)


def residual_sine_layer(x, w1, b1, w2, b2, *, omega_0=30.0,
                        weight_1=1.0, weight_2=1.0, weight_3=1.0, weight_4=1.0,
                        tb_rows=4096, lane_width=128,
                        matmul_dtype=jnp.float32):
    """x: (B, F) f32. w1, w2: (F, F) PyTorch layout (out, in). b1, b2: (F,)."""
    B, F = x.shape
    del weight_1, weight_4  # dead on the live path of the reference forward

    # ---- Fold omega_0 / weight_3 into weights & biases (one-time, in XLA) ---
    # sigmoid(omega_0 * ((weight_3*x) @ W1.T + b1)) == sigmoid(x @ W1t' + b1')
    w1t = (float(omega_0) * float(weight_3)) * jnp.asarray(w1, jnp.float32).T
    w2t = float(omega_0) * jnp.asarray(w2, jnp.float32).T
    b1f = float(omega_0) * jnp.asarray(b1, jnp.float32)
    b2f = float(omega_0) * jnp.asarray(b2, jnp.float32)

    # ---- Lane-dense repack: `pack` rows per 128-lane packed row -------------
    if F < lane_width and lane_width % F == 0:
        pack = lane_width // F
    else:
        pack = 1
    Fp = F * pack

    rows = pl.cdiv(B, pack)          # packed row count
    b_packed = rows * pack
    xf = x
    if b_packed != B:
        # Pad at most pack-1 rows so the contiguous lane repack works.  No
        # tile-multiple padding: the ragged last grid block is handled by
        # Pallas (rows are independent; OOB writes are dropped).
        xf = jnp.pad(xf, ((0, b_packed - B), (0, 0)))
    x_packed = xf.reshape(rows, Fp)  # free contiguous reshape (no transpose)

    if pack > 1:
        eye = jnp.eye(pack, dtype=jnp.float32)
        w1t_p = jnp.kron(eye, w1t)                  # (Fp, Fp) block-diagonal
        w2t_p = jnp.kron(eye, w2t)
        b1_p = jnp.tile(b1f, pack).reshape(1, Fp)
        b2_p = jnp.tile(b2f, pack).reshape(1, Fp)
    else:
        w1t_p, w2t_p = w1t, w2t
        b1_p, b2_p = b1f.reshape(1, Fp), b2f.reshape(1, Fp)
    w1t_p = w1t_p.astype(matmul_dtype)
    w2t_p = w2t_p.astype(matmul_dtype)

    # ---- Row-tile / grid selection -------------------------------------------
    #  * large B: tb_rows (4096 packed rows = 2 MiB f32 tile) -> <10% step
    #    overhead, ~16-22 MiB VMEM with double-buffering + intermediates
    #    (within the 32 MiB scoped default; re-derive before raising on v7x's
    #    64 MiB physical VMEM).
    #  * small/medium B: >= 2 roughly-even steps so both v7x TCs get work.
    tb_rows = int(tb_rows)
    if rows <= 8:
        tr = rows                                   # one tiny full-dim block
    else:
        n_steps = max(2, pl.cdiv(rows, tb_rows))
        tr = min(tb_rows, _round_up(pl.cdiv(rows, n_steps), 8))
    grid = pl.cdiv(rows, tr)

    kernel = functools.partial(_residual_sigmoid_kernel,
                               weight_2=float(weight_2))

    out_packed = pl.pallas_call(
        kernel,
        out_shape=jax.ShapeDtypeStruct((rows, Fp), x.dtype),
        grid_spec=pltpu.PrefetchScalarGridSpec(
            num_scalar_prefetch=0,
            grid=(grid,),
            in_specs=[
                pl.BlockSpec((tr, Fp), lambda i: (i, 0)),   # packed x tile
                pl.BlockSpec((Fp, Fp), lambda i: (0, 0)),   # W1' (resident)
                pl.BlockSpec((1, Fp), lambda i: (0, 0)),    # b1'
                pl.BlockSpec((Fp, Fp), lambda i: (0, 0)),   # W2' (resident)
                pl.BlockSpec((1, Fp), lambda i: (0, 0)),    # b2'
            ],
            out_specs=pl.BlockSpec((tr, Fp), lambda i: (i, 0)),
        ),
        compiler_params=pltpu.CompilerParams(
            dimension_semantics=("parallel",)),
    )(x_packed, w1t_p, b1_p, w2t_p, b2_p)

    out = out_packed.reshape(b_packed, F)           # free contiguous reshape
    if b_packed != B:                               # only when B % pack != 0
        out = out[:B]
    return out


def _reference(x, w1, b1, w2, b2, omega_0, weight_2, weight_3):
    # Pure-JAX reference of the intended forward (sigmoid path + residual).
    lin1 = lambda v: v @ w1.T + b1
    lin2 = lambda v: v @ w2.T + b2
    sig1 = jax.nn.sigmoid(omega_0 * lin1(weight_3 * x))
    sig2 = jax.nn.sigmoid(omega_0 * lin2(sig1))
    return weight_2 * (x + sig2)


if __name__ == "__main__":
    features = 64
    omega_0 = 30.0
    # ave_first / ave_second / ave_third / ave_forth = False -> all weights 1.0
    weight_1 = weight_2 = weight_3 = weight_4 = 1.0

    key = jax.random.PRNGKey(0)
    kx, kw1, kb1, kw2, kb2 = jax.random.split(key, 5)

    # init_weights(): weight ~ U(-sqrt(6/F)/omega_0, +sqrt(6/F)/omega_0)
    #                 bias   ~ U(-1/sqrt(F), +1/sqrt(F))  (PyTorch Linear default)
    wbound = (6.0 / features) ** 0.5 / omega_0
    bbound = 1.0 / (features ** 0.5)
    w1 = jax.random.uniform(kw1, (features, features), jnp.float32, -wbound, wbound)
    w2 = jax.random.uniform(kw2, (features, features), jnp.float32, -wbound, wbound)
    b1 = jax.random.uniform(kb1, (features,), jnp.float32, -bbound, bbound)
    b2 = jax.random.uniform(kb2, (features,), jnp.float32, -bbound, bbound)

    ok = True
    # 256: even split into 2 blocks; 100: ragged last block; 101: odd B
    # (exercises the <=1-row pack padding + trailing slice path).
    for batch in (256, 100, 101):
        x = jax.random.uniform(kx, (batch, features), jnp.float32, -1.0, 1.0)
        out = residual_sine_layer(
            x, w1, b1, w2, b2,
            omega_0=omega_0, weight_1=weight_1, weight_2=weight_2,
            weight_3=weight_3, weight_4=weight_4)
        out = jax.block_until_ready(out)
        ref = _reference(x, w1, b1, w2, b2, omega_0, weight_2, weight_3)
        assert out.shape == (batch, features)
        ok &= bool(jnp.allclose(out, ref, atol=2e-5, rtol=1e-5))

    assert ok, "mismatch vs reference"
    print("KERNEL_OK")
</pallas_src>

<mosaic_0001>
module attributes {stable_mosaic.version = 11 : i64} {
  func.func @_residual_sigmoid_kernel(%arg0: i32, %arg1: memref<64x128xf32, #tpu.memory_space<vmem>>, %arg2: memref<128x128xf32, #tpu.memory_space<vmem>>, %arg3: memref<1x128xf32, #tpu.memory_space<vmem>>, %arg4: memref<128x128xf32, #tpu.memory_space<vmem>>, %arg5: memref<1x128xf32, #tpu.memory_space<vmem>>, %arg6: memref<64x128xf32, #tpu.memory_space<vmem>>) attributes {dimension_semantics = [#tpu.dimension_semantics<parallel>], iteration_bounds = array<i64: 2>, scalar_prefetch = 0 : i64, scratch_operands = 0 : i64, tpu.core_type = #tpu.core_type<tc>, window_params = [{transform_indices = @transform_0, window_bounds = array<i64: 64, 128>}, {pipeline_mode = #tpu.pipeline_mode<synchronous>, transform_indices = @transform_1, window_bounds = array<i64: 128, 128>}, {pipeline_mode = #tpu.pipeline_mode<synchronous>, transform_indices = @transform_2, window_bounds = array<i64: 1, 128>}, {pipeline_mode = #tpu.pipeline_mode<synchronous>, transform_indices = @transform_3, window_bounds = array<i64: 128, 128>}, {pipeline_mode = #tpu.pipeline_mode<synchronous>, transform_indices = @transform_4, window_bounds = array<i64: 1, 128>}, {transform_indices = @transform_5, window_bounds = array<i64: 64, 128>}]} {
    %c0 = arith.constant 0 : index
    %c0_0 = arith.constant 0 : index
    %0 = vector.load %arg1[%c0, %c0_0] : memref<64x128xf32, #tpu.memory_space<vmem>>, vector<64x128xf32>
    %c0_1 = arith.constant 0 : index
    %c0_2 = arith.constant 0 : index
    %1 = vector.load %arg2[%c0_1, %c0_2] : memref<128x128xf32, #tpu.memory_space<vmem>>, vector<128x128xf32>
    %cst = arith.constant dense<0.000000e+00> : vector<64x128xf32>
    %2 = tpu.matmul %0, %1, %cst {dimension_numbers = #tpu.dot_dimension_numbers<[1], [0], [0], [1], [0, 0, 1, 1], [], []>} : vector<64x128xf32>, vector<128x128xf32>, vector<64x128xf32> -> vector<64x128xf32>
    %c0_3 = arith.constant 0 : index
    %c0_4 = arith.constant 0 : index
    %3 = vector.load %arg3[%c0_3, %c0_4] : memref<1x128xf32, #tpu.memory_space<vmem>>, vector<1x128xf32>
    %4 = vector.broadcast %3 : vector<1x128xf32> to vector<64x128xf32>
    %5 = arith.addf %2, %4 : vector<64x128xf32>
    %cst_5 = arith.constant 5.000000e-01 : f32
    %6 = vector.broadcast %cst_5 : f32 to vector<64x128xf32>
    %7 = arith.mulf %6, %5 : vector<64x128xf32>
    %8 = math.tanh %7 : vector<64x128xf32>
    %cst_6 = arith.constant 1.000000e+00 : f32
    %9 = vector.broadcast %cst_6 : f32 to vector<64x128xf32>
    %10 = arith.addf %8, %9 : vector<64x128xf32>
    %cst_7 = arith.constant 5.000000e-01 : f32
    %11 = vector.broadcast %cst_7 : f32 to vector<64x128xf32>
    %12 = arith.mulf %11, %10 : vector<64x128xf32>
    %c0_8 = arith.constant 0 : index
    %c0_9 = arith.constant 0 : index
    %13 = vector.load %arg4[%c0_8, %c0_9] : memref<128x128xf32, #tpu.memory_space<vmem>>, vector<128x128xf32>
    %cst_10 = arith.constant dense<0.000000e+00> : vector<64x128xf32>
    %14 = tpu.matmul %12, %13, %cst_10 {dimension_numbers = #tpu.dot_dimension_numbers<[1], [0], [0], [1], [0, 0, 1, 1], [], []>} : vector<64x128xf32>, vector<128x128xf32>, vector<64x128xf32> -> vector<64x128xf32>
    %c0_11 = arith.constant 0 : index
    %c0_12 = arith.constant 0 : index
    %15 = vector.load %arg5[%c0_11, %c0_12] : memref<1x128xf32, #tpu.memory_space<vmem>>, vector<1x128xf32>
    %16 = vector.broadcast %15 : vector<1x128xf32> to vector<64x128xf32>
    %17 = arith.addf %14, %16 : vector<64x128xf32>
    %cst_13 = arith.constant 5.000000e-01 : f32
    %18 = vector.broadcast %cst_13 : f32 to vector<64x128xf32>
    %19 = arith.mulf %18, %17 : vector<64x128xf32>
    %20 = math.tanh %19 : vector<64x128xf32>
    %cst_14 = arith.constant 1.000000e+00 : f32
    %21 = vector.broadcast %cst_14 : f32 to vector<64x128xf32>
    %22 = arith.addf %20, %21 : vector<64x128xf32>
    %cst_15 = arith.constant 5.000000e-01 : f32
    %23 = vector.broadcast %cst_15 : f32 to vector<64x128xf32>
    %24 = arith.mulf %23, %22 : vector<64x128xf32>
    %25 = arith.addf %0, %24 : vector<64x128xf32>
    %c0_16 = arith.constant 0 : index
    %c0_17 = arith.constant 0 : index
    %26 = vector.load %arg6[%c0_16, %c0_17] : memref<64x128xf32, #tpu.memory_space<vmem>>, vector<64x128xf32>
    tpu.vector_store %arg6[%c0_16, %c0_17], %25 {strides = array<i32>} : memref<64x128xf32, #tpu.memory_space<vmem>>, vector<64x128xf32>,
    return
  }
  func.func @transform_0(%arg0: i32) -> (i32, i32) {
    %c0_i32 = arith.constant 0 : i32
    %c0_i32_0 = arith.constant 0 : i32
    return %arg0, %c0_i32 : i32, i32
  }
  func.func @transform_1(%arg0: i32) -> (i32, i32) {
    %c0_i32 = arith.constant 0 : i32
    %c0_i32_0 = arith.constant 0 : i32
    %c0_i32_1 = arith.constant 0 : i32
    return %c0_i32, %c0_i32_0 : i32, i32
  }
  func.func @transform_2(%arg0: i32) -> (i32, i32) {
    %c0_i32 = arith.constant 0 : i32
    %c0_i32_0 = arith.constant 0 : i32
    %c0_i32_1 = arith.constant 0 : i32
    return %c0_i32, %c0_i32_0 : i32, i32
  }
  func.func @transform_3(%arg0: i32) -> (i32, i32) {
    %c0_i32 = arith.constant 0 : i32
    %c0_i32_0 = arith.constant 0 : i32
    %c0_i32_1 = arith.constant 0 : i32
    return %c0_i32, %c0_i32_0 : i32, i32
  }
  func.func @transform_4(%arg0: i32) -> (i32, i32) {
    %c0_i32 = arith.constant 0 : i32
    %c0_i32_0 = arith.constant 0 : i32
    %c0_i32_1 = arith.constant 0 : i32
    return %c0_i32, %c0_i32_0 : i32, i32
  }
  func.func @transform_5(%arg0: i32) -> (i32, i32) {
    %c0_i32 = arith.constant 0 : i32
    %c0_i32_0 = arith.constant 0 : i32
    return %arg0, %c0_i32 : i32, i32
  }
}

</mosaic_0001>

<bundles_post_ra>
// kernel: tpu_custom_call.1
= control target key start
LH: loop header
LB: loop body
LE: loop exit
PB: predicated region body
PF: predicated region fallthrough
CT: control target
= control target key end

     0   :  { %10 = vsyncpa [#allocation3], 0  ;;  %s1551_s0 = inlined_call_operand.hbm [shape: f32[128,128], index: 0, kind: input, shape index: {}]   ;;  %s1552_s1 = inlined_call_operand.hbm [shape: f32[128,128], index: 1, kind: input, shape index: {}]   ;;  %s1553_s2 = inlined_call_operand.vmem [shape: f32[1,128], index: 2, kind: input, shape index: {}]   ;;  %s1554_s3 = inlined_call_operand.hbm [shape: f32[128,128], index: 3, kind: input, shape index: {}]   ;;  %s1555_s4 = inlined_call_operand.vmem [shape: f32[1,128], index: 4, kind: input, shape index: {}]   ;;  %s1556_s5 = inlined_call_operand.hbm [shape: f32[128,128], index: 5, kind: output, shape index: {}]  }
   0x1   :  { %12 = vsyncpa [#allocation3 + $0x1], 0 }
   0x2   :  { %13 = vsyncpa [#allocation6], 0 }
   0x3   :  { %14 = vsyncpa [#allocation4], 0 }
   0x4   :  { %16 = vsyncpa [#allocation4 + $0x1], 0  ;;  %s1245_s18 = smov 0   ;;  %s1247_s19 = smov 0  }
   0x5   :  { %s1249_s20 = smov 0   ;;  %s1251_s21 = smov 0  }
   0x6 LB: > { %s1266_s22 = sadd.s32 4294967295, %s1205_s21   ;;  %s724_s23 = sadd.s32 4294967294, %s1205_s21   ;;  %s1205_s21 = sphi %s1251_s21, %s1576_s21   ;;  %s1201_s20 = sphi %s1249_s20, %s1575_s20   ;;  %s1197_s19 = sphi %s1247_s19, %s1574_s19   ;;  %s1193_s18 = sphi %s1245_s18, %s1573_s18  }
   0x7   : > { %p42_p0 = scmp.ne.s32.totalorder %s1197_s19, %s1193_s18  ;;  %p1557_p1 = scmp.eq.s32.totalorder %s1266_s22, 0 }
   0x8   : > { %p156_p3 = scmp.eq.s32.totalorder %s724_s23, 1  ;;  %p725_p5 = scmp.ge.s32.totalorder %s1205_s21, 1 }
   0x9   : > { %p1275_p4 = por %p1557_p1, %p42_p0  ;;  %p163_p7 = scmp.lt.s32.totalorder %s1205_s21, 3 }
   0xa   : > { %p1280_p6 = por %p156_p3, %p42_p0  ;;  %s1207_s27 = smov [#allocation5]  }
   0xb   : > { %s1560_s24 = scalar_select %p1275_p4, 1, 0 }
   0xc   : > { %s1561_s25 = scalar_select %p1280_p6, 1, 0 }
   0xd   : > { %p1285_p8 = pnand %p725_p5, %p163_p7  ;;  %s175_s28 = sshll.u32 %s1207_s27, 4  ;;  %s1289_s28 = int_to_ptr.vmem [resolvable:$true] %s175_s28 }
   0xe   : > { %s1208_s30 = smov [#allocation7]   ;;  %s1049_s9 = scalar_lea.hbm %s1552_s1, 2048 }
   0xf   : > { %p958_p9 = pneg %p1285_p8  ;;  %s191_s6 = sshll.u32 %s1208_s30, 4  ;;  %s1300_s6 = int_to_ptr.vmem [resolvable:$true] %s191_s6 }
  0x10   : > { %p1050_p12 = scmp.ne.s32.totalorder %s1552_s1, %s1049_s9  ;;  %p1056_p5 = scmp.lt.u32.totalorder %s1049_s9, %s1552_s1 }
  0x11   : > { %p1296_p11 = pnand %p958_p9, %p1557_p1 }
  0x13   : > { %p1051_p13 = pneg %p1296_p11 }
  0x15   : > { %p1052_p0 = pnand %p1051_p13, %p1050_p12 }
  0x17   : > { %p1053_p3 = pneg %p1052_p0 }
  0x19   : > { %p1058_p7 = pnand %p1056_p5, %p1053_p3 }
  0x1b   : > { %1061 = shalt.err (!%p1058_p7)
}
  0x1c   : > { %s1062_s14 = scalar_lea.vmem %s1289_s28, 2048  ;;  %p1070_p2 = scmp.lt.s32.totalorder %s1289_s28, %s1289_s28 }
  0x1d   : > { %p1063_p9 = scmp.ne.s32.totalorder %s1289_s28, %s1062_s14  ;;  %p1071_p12 = scmp.lt.s32.totalorder %s1062_s14, %s1062_s14 }
  0x1f   : > { %p1065_p10 = pnand %p1063_p9, %p1051_p13  ;;  %p1072_p0 = por %p1071_p12, %p1070_p2 }
  0x21   : > { %p1066_p1 = pneg %p1065_p10 }
  0x23   : > { %p1073_p6 = pnand %p1072_p0, %p1066_p1 }
  0x25   : > { %1076 = shalt.err (!%p1073_p6)
}
  0x26   : > { %s1209_s15 = smov 128   ;;  %s1210_s16 = smov 8  }
  0x27   : > { %961 = dma.hbm_to_vmem [thread:$0]  (!%p1296_p11), %s1552_s1, 2048, %s1289_s28, [#allocation6], %s1209_s15, %s1209_s15, %s1210_s16  }
  0x28   : > { %s1077_s7 = scalar_lea.hbm %s1554_s3, 2048 }
  0x29   : > { %p1078_p1 = scmp.ne.s32.totalorder %s1554_s3, %s1077_s7  ;;  %p1084_p10 = scmp.lt.u32.totalorder %s1077_s7, %s1554_s3 }
  0x2b   : > { %p1080_p2 = pnand %p1078_p1, %p1051_p13 }
  0x2d   : > { %p1081_p6 = pneg %p1080_p2 }
  0x2f   : > { %p1086_p3 = pnand %p1084_p10, %p1081_p6 }
  0x31   : > { %1089 = shalt.err (!%p1086_p3)
}
  0x32   : > { %s1090_s28 = scalar_lea.vmem %s1300_s6, 2048  ;;  %p1098_p12 = scmp.lt.s32.totalorder %s1300_s6, %s1300_s6 }
  0x33   : > { %p1091_p5 = scmp.ne.s32.totalorder %s1300_s6, %s1090_s28  ;;  %p1099_p0 = scmp.lt.s32.totalorder %s1090_s28, %s1090_s28 }
  0x35   : > { %p1093_p7 = pnand %p1091_p5, %p1051_p13  ;;  %p1100_p1 = por %p1099_p0, %p1098_p12 }
  0x37   : > { %p1094_p9 = pneg %p1093_p7 }
  0x39   : > { %p1101_p2 = pnand %p1100_p1, %p1094_p9 }
  0x3b   : > { %1104 = shalt.err (!%p1101_p2)
}
  0x3c   : > { %964 = dma.hbm_to_vmem [thread:$0]  (!%p1296_p11), %s1554_s3, 2048, %s1300_s6, [#allocation6], %s1209_s15, %s1209_s15, %s1210_s16  }
  0x3d   : > { %s1361_s29 = sadd.s32 1, %s1205_s21   ;;  %s29_s14 = sadd.s32 1, %s1201_s20 }
  0x3e   : > { %s26_s17 = ssub.s32 %s1205_s21, %s1361_s29  ;;  %p36_p13 = scmp.ne.s32.totalorder %s1201_s20, %s1197_s19 }
  0x3f   : > { %p27_p6 = scmp.eq.s32.totalorder %s26_s17, 0  ;;  %p37_p10 = scmp.eq.s32.totalorder %s1205_s21, 0 }
  0x40   : > { %p1564_p3 = scmp.eq.s32.totalorder %s1266_s22, 1  ;;  %p975_p7 = scmp.lt.s32.totalorder %s1205_s21, 2 }
  0x41   : > { %s1377_s27 = scalar_select %p27_p6, %s1201_s20, %s29_s14  }
  0x42   : > { %p1371_p5 = por %p1564_p3, %p36_p13  ;;  %p38_p9 = por %p37_p10, %p36_p13 }
  0x43   : > { %s208_s30 = sand.u32 1, %s1201_s20   ;;  %s744_s6 = sshll.u32 %s1205_s21, 10 }
  0x44   : > { %s1565_s23 = scalar_select %p1371_p5, 1, 0 }
  0x45   : > { %s729_s7 = sshll.u32 %s208_s30, 6  ;;  %s1384_s10 = scalar_lea.hbm %s1551_s0, %s744_s6 }
  0x46   : > { %s212_s11 = scalar_lea.vmem [#allocation2], %s729_s7  ;;  %p1388_p11 = pnand %p975_p7, %p38_p9 }
  0x47   : > { %s219_s28 = sshll.u32 %s212_s11, 4  ;;  %s1392_s13 = scalar_lea.sflag [#allocation3], %s208_s30  ;;  %s1386_s28 = int_to_ptr.vmem [resolvable:$true] %s219_s28 }
  0x48   : > { %s1105_s14 = scalar_lea.hbm %s1384_s10, 1024  ;;  %p1107_p0 = pneg %p1388_p11 }
  0x49   : > { %p1106_p12 = scmp.ne.s32.totalorder %s1384_s10, %s1105_s14  ;;  %s1110_s6 = scalar_lea.hbm %s1551_s0, 2048 }
  0x4a   : > { %p1111_p13 = scmp.lt.u32.totalorder %s1384_s10, %s1551_s0  ;;  %p1112_p6 = scmp.lt.u32.totalorder %s1110_s6, %s1105_s14 }
  0x4b   : > { %p1108_p1 = pnand %p1107_p0, %p1106_p12  ;;  %p1114_p3 = scmp.lt.u32.totalorder %s1105_s14, %s1384_s10 }
  0x4c   : > { %p1113_p10 = por %p1112_p6, %p1111_p13 }
  0x4d   : > { %p1109_p2 = pneg %p1108_p1 }
  0x4e   : > { %p1115_p7 = por %p1114_p3, %p1113_p10 }
  0x50   : > { %p1116_p9 = pnand %p1115_p7, %p1109_p2 }
  0x52   : > { %1119 = shalt.err (!%p1116_p9)
}
  0x53   : > { %s1120_s30 = scalar_lea.vmem %s1386_s28, 1024  ;;  %s1211_s11 = smov [#allocation2]  }
  0x54   : > { %p1121_p12 = scmp.ne.s32.totalorder %s1386_s28, %s1120_s30  ;;  %s1125_s17 = sshll.u32 %s1211_s11, 4  ;;  %s1126_s17 = int_to_ptr.vmem [resolvable:$false] %s1125_s17 }
  0x55   : > { %s1127_s7 = scalar_lea.vmem %s1126_s17, 2048  ;;  %p1128_p4 = scmp.lt.s32.totalorder %s1386_s28, %s1126_s17 }
  0x56   : > { %p1123_p1 = pnand %p1121_p12, %p1107_p0  ;;  %p1129_p13 = scmp.lt.s32.totalorder %s1127_s7, %s1120_s30 }
  0x58   : > { %p1124_p5 = pneg %p1123_p1  ;;  %p1130_p6 = por %p1129_p13, %p1128_p4 }
  0x5a   : > { %p1131_p10 = pnand %p1130_p6, %p1124_p5 }
  0x5c   : > { %1134 = shalt.err (!%p1131_p10)
}
  0x5d   : > { %968 = dma.hbm_to_vmem [thread:$0]  (!%p1388_p11), %s1384_s10, 1024, %s1386_s28, %s1392_s13, %s1209_s15, %s1209_s15, %s1210_s16  }
  0x5e   : > { %231 = sbr.rel (%p1285_p8) target bundleno = 634 (0x27a), region = 40  ;;  %s1426_s14 = sand.u32 (!%p1285_p8), 1, %s1197_s19  }
  0x5f   : > { %s733_s6 = sshll.u32 (!%p1285_p8), %s1426_s14, 6  ;;  %s234_s8 = scalar_lea.sflag (!%p1285_p8), [#allocation3], %s1426_s14 }
  0x60   : > { %s1432_s12 = scalar_lea.vmem (!%p1285_p8), [#allocation2], %s733_s6  ;;  %p1567_p4 = scmp.ne.s32.totalorder (!%p1285_p8), %s1560_s24, 0 }
  0x65   : > { %1180 = dma.done.wait (%p1567_p4), %s234_s8, 1024  }
  0x66   : > { %1182 = vsyncadd (%p1567_p4), %s234_s8, 4294966272  ;;  %p1568_p5 = scmp.eq.s32.totalorder %s1266_s22, 0 }
  0x68   : > { %1184 = dma.done.wait (%p1568_p5), [#allocation6], 4096   ;;  %p1569_p8 = pmov %p1568_p5 }
  0x69   : > { %v282_v0 = vld [vmem:[#allocation5] sm:$0xff]  ;;  %v283_v1 = vld [vmem:[#allocation5 + $0x8] sm:$0xff]  ;;  %v284_v2 = vld [vmem:[#allocation5 + $0x10] sm:$0xff]  ;;  %s1484_s10 = scalar_lea.vmem [#allocation8], %s733_s6  ;;  %s745_s28 = sshll.u32 %s1266_s22, 10 }
  0x6a   : > { %1186 = vsyncadd (%p1569_p8), [#allocation6], 4294963200  ;;  %v882_v3 = vpack.c.bf16 %v283_v1, %v282_v0  ;;  %v285_v4 = vld [vmem:[#allocation5 + $0x18] sm:$0xff]  ;;  %v286_v6 = vld [vmem:[#allocation5 + $0x20] sm:$0xff]  ;;  %s632_s13 = sshll.u32 %s1484_s10, 4  ;;  %s1502_s11 = scalar_lea.hbm %s1556_s5, %s745_s28  ;;  %s1504_s13 = int_to_ptr.vmem [resolvable:$true] %s632_s13 }
  0x6b   : > { %v886_v5 = vpack.c.bf16 %v285_v4, %v284_v2  ;;  %v287_v7 = vld [vmem:[#allocation5 + $0x28] sm:$0xff]  ;;  %v1443_v9 = vld [vmem:[%s1432_s12] sm:$0xff]  ;;  %v288_v10 = vld [vmem:[#allocation5 + $0x30] sm:$0xff]  ;;  %s619_s22 = scalar_lea.sflag [#allocation4], %s1426_s14  ;;  %s1135_s17 = scalar_lea.vmem %s1504_s13, 1024 }
  0x6c   : > { %883 = vmatprep.subr.bf16.mxu0 %v882_v3  ;;  %v890_v8 = vpack.c.bf16 %v287_v7, %v286_v6  ;;  %v289_v11 = vld [vmem:[#allocation5 + $0x38] sm:$0xff]  ;;  %826 = vmatprep.mubr.f32.mxu0 %v1443_v9  ;;  %v442_v12 = vld [vmem:[#allocation7] sm:$0xff]  ;;  %v443_v13 = vld [vmem:[#allocation7 + $0x8] sm:$0xff]  ;;  %p1136_p11 = scmp.ne.s32.totalorder %s1504_s13, %s1135_s17  ;;  %p1570_p0 = scmp.ne.s32.totalorder %s1565_s23, 0 }
  0x6d   : > { %885 = vmatpush3.bf16.msra.mxu0 %v882_v3  ;;  %v444_v14 = vld [vmem:[#allocation7 + $0x10] sm:$0xff]  ;;  %v894_v15 = vpack.c.bf16 %v289_v11, %v288_v10  ;;  %v290_v16 = vld [vmem:[#allocation5 + $0x40] sm:$0xff]  ;;  %v914_v17 = vpack.c.bf16 %v443_v13, %v442_v12  ;;  %v445_v18 = vld [vmem:[#allocation7 + $0x18] sm:$0xff]  ;;  %s1212_s7 = smov [#allocation8]  }
  0x6e   : > { %887 = vmatprep.subr.bf16.mxu0 %v886_v5  ;;  %v291_v19 = vld [vmem:[#allocation5 + $0x48] sm:$0xff]  ;;  %v918_v20 = vpack.c.bf16 %v445_v18, %v444_v14  ;;  %v446_v21 = vld [vmem:[#allocation7 + $0x20] sm:$0xff]  ;;  %v292_v25 = vld [vmem:[#allocation5 + $0x50] sm:$0xff]  ;;  %p1137_p2 = pnand %p1136_p11, %p1570_p0  ;;  %s1139_s6 = sshll.u32 %s1212_s7, 4  ;;  %s1140_s6 = int_to_ptr.vmem [resolvable:$false] %s1139_s6 }
  0x6f   : > { %v447_v22 = vld [vmem:[#allocation7 + $0x28] sm:$0xff]  ;;  %915 = vmatprep.subr.bf16.mxu1 %v914_v17  ;;  %v898_v23 = vpack.c.bf16 %v291_v19, %v290_v16  ;;  %v293_v26 = vld [vmem:[#allocation5 + $0x58] sm:$0xff]  ;;  %v294_v28 = vld [vmem:[#allocation5 + $0x60] sm:$0xff]  ;;  %s1141_s8 = scalar_lea.vmem %s1140_s6, 2048  ;;  %p1142_p7 = scmp.lt.s32.totalorder %s1504_s13, %s1140_s6 }
  0x70   : > { %917 = vmatpush3.bf16.msra.mxu1 %v914_v17  ;;  %v922_v24 = vpack.c.bf16 %v447_v22, %v446_v21  ;;  %v902_v27 = vpack.c.bf16 %v293_v26, %v292_v25  ;;  %v295_v29 = vld [vmem:[#allocation5 + $0x68] sm:$0xff]  ;;  %v296_v31 = vld [vmem:[#allocation5 + $0x70] sm:$0xff]  ;;  %v297_v32 = vld [vmem:[#allocation5 + $0x78] sm:$0xff]  ;;  %p1138_p3 = pneg %p1137_p2  ;;  %p1143_p9 = scmp.lt.s32.totalorder %s1141_s8, %s1135_s17 }
  0x71   : > { %889 = vmatpush3.bf16.msra.mxu0 %v886_v5  ;;  %919 = vmatprep.subr.bf16.mxu1 %v918_v20  ;;  %v906_v30 = vpack.c.bf16 %v295_v29, %v294_v28  ;;  %v910_v33 = vpack.c.bf16 %v297_v32, %v296_v31  ;;  %v1447_v34 = vld [vmem:[%s1432_s12 + $0x8] sm:$0xff]  ;;  %v1450_v35 = vld [vmem:[%s1432_s12 + $0x10] sm:$0xff]  ;;  %v1455_v36 = vld [vmem:[%s1432_s12 + $0x18] sm:$0xff] }
  0x72   : > { %891 = vmatprep.subr.bf16.mxu0 %v890_v8  ;;  %v1458_v37 = vld [vmem:[%s1432_s12 + $0x20] sm:$0xff]  ;;  %v1463_v38 = vld [vmem:[%s1432_s12 + $0x28] sm:$0xff]  ;;  %v1466_v39 = vld [vmem:[%s1432_s12 + $0x30] sm:$0xff]  ;;  %p1144_p12 = por %p1143_p9, %p1142_p7 }
  0x73   : > { %v1471_v40 = vld [vmem:[%s1432_s12 + $0x38] sm:$0xff]  ;;  %v448_v41 = vld [vmem:[#allocation7 + $0x30] sm:$0xff]  ;;  %v450_v44 = vld [vmem:[#allocation7 + $0x40] sm:$0xff] }
  0x74   : > { %921 = vmatpush3.bf16.msra.mxu1 %v918_v20  ;;  %v449_v42 = vld [vmem:[#allocation7 + $0x38] sm:$0xff]  ;;  %v451_v45 = vld [vmem:[#allocation7 + $0x48] sm:$0xff]  ;;  %v452_v47 = vld [vmem:[#allocation7 + $0x50] sm:$0xff]  ;;  %p1145_p1 = pnand %p1144_p12, %p1138_p3 }
  0x75   : > { %893 = vmatpush3.bf16.msra.mxu0 %v890_v8  ;;  %923 = vmatprep.subr.bf16.mxu1 %v922_v24  ;;  %v926_v43 = vpack.c.bf16 %v449_v42, %v448_v41  ;;  %v930_v46 = vpack.c.bf16 %v451_v45, %v450_v44  ;;  %v453_v48 = vld [vmem:[#allocation7 + $0x58] sm:$0xff]  ;;  %v454_v50 = vld [vmem:[#allocation7 + $0x60] sm:$0xff]  ;;  %v455_v51 = vld [vmem:[#allocation7 + $0x68] sm:$0xff] }
  0x76   : > { %895 = vmatprep.subr.bf16.mxu0 %v894_v15  ;;  %v934_v49 = vpack.c.bf16 %v453_v48, %v452_v47  ;;  %v938_v52 = vpack.c.bf16 %v455_v51, %v454_v50  ;;  %v456_v53 = vld [vmem:[#allocation7 + $0x70] sm:$0xff]  ;;  %v457_v54 = vld [vmem:[#allocation7 + $0x78] sm:$0xff]  ;;  %v737_v56 = vld [vmem:[%s1553_s2] ss:$0 sm:$0xff] }
  0x77   : > { %v942_v55 = vpack.c.bf16 %v457_v54, %v456_v53 }
  0x78   : > { %925 = vmatpush3.bf16.msra.mxu1 %v922_v24 }
  0x79   : > { %897 = vmatpush3.bf16.msra.mxu0 %v894_v15  ;;  %927 = vmatprep.subr.bf16.mxu1 %v926_v43 }
  0x7a   : > { %899 = vmatprep.subr.bf16.mxu0 %v898_v23 }
  0x7c   : > { %929 = vmatpush3.bf16.msra.mxu1 %v926_v43 }
  0x7d   : > { %901 = vmatpush3.bf16.msra.mxu0 %v898_v23  ;;  %931 = vmatprep.subr.bf16.mxu1 %v930_v46 }
  0x7e   : > { %903 = vmatprep.subr.bf16.mxu0 %v902_v27 }
  0x80   : > { %933 = vmatpush3.bf16.msra.mxu1 %v930_v46 }
  0x81   : > { %905 = vmatpush3.bf16.msra.mxu0 %v902_v27  ;;  %935 = vmatprep.subr.bf16.mxu1 %v934_v49 }
  0x82   : > { %907 = vmatprep.subr.bf16.mxu0 %v906_v30 }
  0x84   : > { %937 = vmatpush3.bf16.msra.mxu1 %v934_v49  ;;  %v738_v49 = vld [vmem:[%s1555_s4] ss:$0 sm:$0xff] }
  0x85   : > { %909 = vmatpush3.bf16.msra.mxu0 %v906_v30  ;;  %939 = vmatprep.subr.bf16.mxu1 %v938_v52 }
  0x86   : > { %911 = vmatprep.subr.bf16.mxu0 %v910_v33 }
  0x88   : > { %941 = vmatpush3.bf16.msra.mxu1 %v938_v52 }
  0x89   : > { %913 = vmatpush3.bf16.msra.mxu0 %v910_v33  ;;  %943 = vmatprep.subr.bf16.mxu1 %v942_v55 }
  0x8c   : > { %827 = vmatmul.mubr.f32.vlgmr.msra.gmra.mrb[0].mxu0 %v1447_v34  ;;  %945 = vmatpush3.bf16.msra.mxu1 %v942_v55 }
  0x8d   : > { %829 = vmatprep.mubr.f32.mxu0 %v1450_v35 }
  0x90   : > { %830 = vmatmul.mubr.f32.gmra.mrb[2].mxu0 %v1455_v36 }
  0x91   : > { %832 = vmatprep.mubr.f32.mxu0 %v1458_v37 }
  0x94   : > { %833 = vmatmul.mubr.f32.gmra.mrb[4].mxu0 %v1463_v38 }
  0x95   : > { %835 = vmatprep.mubr.f32.mxu0 %v1466_v39 }
  0x98   : > { %836 = vmatmul.mubr.f32.gmra.mrb[6].mxu0 %v1471_v40 }
 0x15f   : > { %v828_v57 = vpop.f32.mrb[0].mxu0 }
 0x160   : > { %v377_v58 = vadd.f32 %v828_v57, %v737_v56  ;;  %v371_v59 = vpop.f32.mrb[1].mxu0 }
 0x161   : > { %v372_v60 = vadd.f32 %v737_v56, %v371_v59 }
 0x162   : > { %v411_v61 = vmul.f32 0.5, %v377_v58 }
 0x163   : > { %v410_v62 = vmul.f32 0.5, %v372_v60  ;;  %v831_v63 = vpop.f32.mrb[2].mxu0 }
 0x164   : > { %1017 = vtanh.f32 %v411_v61  ;;  %v387_v0 = vadd.f32 %v831_v63, %v737_v56  ;;  %v381_v1 = vpop.f32.mrb[3].mxu0 }
 0x165   : > { %1019 = vtanh.f32 %v410_v62  ;;  %v382_v2 = vadd.f32 %v737_v56, %v381_v1 }
 0x166   : > { %v413_v3 = vmul.f32 0.5, %v387_v0 }
 0x167   : > { %v412_v4 = vmul.f32 0.5, %v382_v2  ;;  %v834_v5 = vpop.f32.mrb[4].mxu0 }
 0x168   : > { %1021 = vtanh.f32 %v413_v3  ;;  %v397_v6 = vadd.f32 %v834_v5, %v737_v56  ;;  %v391_v7 = vpop.f32.mrb[5].mxu0 }
 0x169   : > { %1023 = vtanh.f32 %v412_v4  ;;  %v392_v8 = vadd.f32 %v737_v56, %v391_v7 }
 0x16a   : > { %v415_v10 = vmul.f32 0.5, %v397_v6 }
 0x16b   : > { %v414_v11 = vmul.f32 0.5, %v392_v8  ;;  %v837_v12 = vpop.f32.mrb[6].mxu0 }
 0x16c   : > { %1025 = vtanh.f32 %v415_v10  ;;  %v407_v13 = vadd.f32 %v837_v12, %v737_v56  ;;  %v401_v14 = vpop.f32.mrb[7].mxu0 }
 0x16d   : > { %1027 = vtanh.f32 %v414_v11  ;;  %v402_v15 = vadd.f32 %v737_v56, %v401_v14 }
 0x16e   : > { %v1018_v16 = vpop.eup %1017  ;;  %v417_v17 = vmul.f32 0.5, %v407_v13 }
 0x16f   : > { %v1020_v18 = vpop.eup %1019  ;;  %v427_v19 = vadd.f32 1.0, %v1018_v16  ;;  %v416_v20 = vmul.f32 0.5, %v402_v15 }
 0x170   : > { %1029 = vtanh.f32 %v417_v17  ;;  %v426_v21 = vadd.f32 1.0, %v1020_v18 }
 0x171   : > { %1031 = vtanh.f32 %v416_v20  ;;  %v435_v26 = vmul.f32 0.5, %v427_v19 }
 0x172   : > { %v1022_v22 = vpop.eup %1021  ;;  %v434_v23 = vmul.f32 0.5, %v426_v21 }
 0x173   : > { %v1024_v24 = vpop.eup %1023  ;;  %v429_v25 = vadd.f32 1.0, %v1022_v22 }
 0x174   : > { %v428_v27 = vadd.f32 1.0, %v1024_v24  ;;  %870 = vmatprep.mubr.f32.mxu1 %v434_v23 }
 0x175   : > { %871 = vmatmul.mubr.f32.vlgmr.msra.gmra.mrb[0].mxu1 %v435_v26  ;;  %v437_v32 = vmul.f32 0.5, %v429_v25 }
 0x176   : > { %v1026_v28 = vpop.eup %1025  ;;  %v436_v29 = vmul.f32 0.5, %v428_v27 }
 0x177   : > { %v1028_v30 = vpop.eup %1027  ;;  %v431_v31 = vadd.f32 1.0, %v1026_v28 }
 0x178   : > { %v430_v33 = vadd.f32 1.0, %v1028_v30  ;;  %873 = vmatprep.mubr.f32.mxu1 %v436_v29 }
 0x179   : > { %874 = vmatmul.mubr.f32.gmra.mrb[2].mxu1 %v437_v32  ;;  %v439_v45 = vmul.f32 0.5, %v431_v31 }
 0x17a   : > { %v1030_v41 = vpop.eup %1029  ;;  %v438_v42 = vmul.f32 0.5, %v430_v33 }
 0x17b   : > { %v1032_v43 = vpop.eup %1031  ;;  %v433_v44 = vadd.f32 1.0, %v1030_v41 }
 0x17c   : > { %v432_v46 = vadd.f32 1.0, %v1032_v43  ;;  %876 = vmatprep.mubr.f32.mxu1 %v438_v42 }
 0x17d   : > { %877 = vmatmul.mubr.f32.gmra.mrb[4].mxu1 %v439_v45  ;;  %v441_v48 = vmul.f32 0.5, %v433_v44 }
 0x17e   : > { %v440_v47 = vmul.f32 0.5, %v432_v46 }
 0x180   : > { %879 = vmatprep.mubr.f32.mxu1 %v440_v47 }
 0x181   : > { %880 = vmatmul.mubr.f32.gmra.mrb[6].mxu1 %v441_v48 }
 0x248   : > { %v872_v50 = vpop.f32.mrb[0].mxu1 }
 0x249   : > { %v537_v51 = vadd.f32 %v872_v50, %v738_v49  ;;  %v531_v52 = vpop.f32.mrb[1].mxu1 }
 0x24a   : > { %v532_v53 = vadd.f32 %v738_v49, %v531_v52 }
 0x24b   : > { %v571_v54 = vmul.f32 0.5, %v537_v51 }
 0x24c   : > { %v570_v55 = vmul.f32 0.5, %v532_v53  ;;  %v875_v56 = vpop.f32.mrb[2].mxu1 }
 0x24d   : > { %1033 = vtanh.f32 %v571_v54  ;;  %v547_v57 = vadd.f32 %v875_v56, %v738_v49  ;;  %v541_v58 = vpop.f32.mrb[3].mxu1 }
 0x24e   : > { %1035 = vtanh.f32 %v570_v55  ;;  %v542_v59 = vadd.f32 %v738_v49, %v541_v58 }
 0x24f   : > { %v573_v60 = vmul.f32 0.5, %v547_v57 }
 0x250   : > { %v572_v61 = vmul.f32 0.5, %v542_v59  ;;  %v878_v62 = vpop.f32.mrb[4].mxu1 }
 0x251   : > { %1037 = vtanh.f32 %v573_v60  ;;  %v557_v63 = vadd.f32 %v878_v62, %v738_v49  ;;  %v551_v0 = vpop.f32.mrb[5].mxu1 }
 0x252   : > { %1039 = vtanh.f32 %v572_v61  ;;  %v552_v1 = vadd.f32 %v738_v49, %v551_v0 }
 0x253   : > { %v575_v2 = vmul.f32 0.5, %v557_v63 }
 0x254   : > { %v574_v3 = vmul.f32 0.5, %v552_v1  ;;  %v881_v4 = vpop.f32.mrb[6].mxu1 }
 0x255   : > { %1041 = vtanh.f32 %v575_v2  ;;  %v567_v5 = vadd.f32 %v881_v4, %v738_v49  ;;  %v561_v6 = vpop.f32.mrb[7].mxu1 }
 0x256   : > { %1043 = vtanh.f32 %v574_v3  ;;  %v562_v7 = vadd.f32 %v738_v49, %v561_v6 }
 0x257   : > { %v1034_v8 = vpop.eup %1033  ;;  %v577_v10 = vmul.f32 0.5, %v567_v5 }
 0x258   : > { %v1036_v11 = vpop.eup %1035  ;;  %v587_v12 = vadd.f32 1.0, %v1034_v8  ;;  %v576_v13 = vmul.f32 0.5, %v562_v7 }
 0x259   : > { %v586_v14 = vadd.f32 1.0, %v1036_v11  ;;  %1045 = vtanh.f32 %v577_v10 }
 0x25a   : > { %v595_v15 = vmul.f32 0.5, %v587_v12  ;;  %1047 = vtanh.f32 %v576_v13 }
 0x25b   : > { %v1038_v16 = vpop.eup %1037  ;;  %v594_v17 = vmul.f32 0.5, %v586_v14 }
 0x25c   : > { %v1040_v18 = vpop.eup %1039  ;;  %v603_v19 = vadd.f32 %v595_v15, %v1447_v34  ;;  %v589_v20 = vadd.f32 1.0, %v1038_v16 }
 0x25d   : > { %v602_v21 = vadd.f32 %v594_v17, %v1443_v9  ;;  %v588_v22 = vadd.f32 1.0, %v1040_v18 }
 0x25e   : > { %611 = vst [vmem:[%s1484_s10 + $0x8] sm:$0xff] %v603_v19  ;;  %v597_v23 = vmul.f32 0.5, %v589_v20 }
 0x25f   : > { %v1042_v24 = vpop.eup %1041  ;;  %610 = vst [vmem:[%s1484_s10] sm:$0xff] %v602_v21  ;;  %v596_v25 = vmul.f32 0.5, %v588_v22 }
 0x260   : > { %v1044_v26 = vpop.eup %1043  ;;  %v605_v34 = vadd.f32 %v597_v23, %v1455_v36  ;;  %v591_v9 = vadd.f32 1.0, %v1042_v24 }
 0x261   : > { %v604_v27 = vadd.f32 %v596_v25, %v1450_v35  ;;  %v590_v28 = vadd.f32 1.0, %v1044_v26 }
 0x262   : > { %613 = vst [vmem:[%s1484_s10 + $0x18] sm:$0xff] %v605_v34  ;;  %v599_v29 = vmul.f32 0.5, %v591_v9 }
 0x263   : > { %v1046_v30 = vpop.eup %1045  ;;  %612 = vst [vmem:[%s1484_s10 + $0x10] sm:$0xff] %v604_v27  ;;  %v598_v31 = vmul.f32 0.5, %v590_v28 }
 0x264   : > { %v1048_v32 = vpop.eup %1047  ;;  %v607_v33 = vadd.f32 %v599_v29, %v1463_v38  ;;  %v593_v41 = vadd.f32 1.0, %v1046_v30 }
 0x265   : > { %v606_v36 = vadd.f32 %v598_v31, %v1458_v37  ;;  %v592_v42 = vadd.f32 1.0, %v1048_v32 }
 0x266   : > { %615 = vst [vmem:[%s1484_s10 + $0x28] sm:$0xff] %v607_v33  ;;  %v601_v35 = vmul.f32 0.5, %v593_v41 }
 0x267   : > { %614 = vst [vmem:[%s1484_s10 + $0x20] sm:$0xff] %v606_v36  ;;  %v600_v43 = vmul.f32 0.5, %v592_v42 }
 0x268   : > { %v609_v44 = vadd.f32 %v601_v35, %v1471_v40 }
 0x269   : > { %v608_v37 = vadd.f32 %v600_v43, %v1466_v39 }
 0x26a   : > { %617 = vst [vmem:[%s1484_s10 + $0x38] sm:$0xff] %v609_v44 }
 0x26b   : > { %616 = vst [vmem:[%s1484_s10 + $0x30] sm:$0xff] %v608_v37 }
 0x26c   : > { %1148 = shalt.err (!%p1145_p1)
}
 0x26d   : > { %s1149_s12 = scalar_lea.hbm %s1502_s11, 1024  ;;  %s1153_s15 = scalar_lea.hbm %s1556_s5, 2048 }
 0x26e   : > { %p1150_p13 = scmp.ne.s32.totalorder %s1502_s11, %s1149_s12  ;;  %p1154_p4 = scmp.lt.u32.totalorder %s1502_s11, %s1556_s5 }
 0x26f   : > { %p1155_p5 = scmp.lt.u32.totalorder %s1153_s15, %s1149_s12  ;;  %p1157_p11 = scmp.lt.u32.totalorder %s1149_s12, %s1502_s11 }
 0x270   : > { %p1151_p6 = pnand %p1150_p13, %p1570_p0 }
 0x271   : > { %p1156_p8 = por %p1155_p5, %p1154_p4 }
 0x272   : > { %p1152_p10 = pneg %p1151_p6 }
 0x273   : > { %p1158_p2 = por %p1157_p11, %p1156_p8 }
 0x275   : > { %p1159_p3 = pnand %p1158_p2, %p1152_p10 }
 0x277   : > { %1162 = shalt.err (!%p1159_p3)
}
 0x278   : > { %s1213_s28 = smov 128   ;;  %s1214_s9 = smov 8  }
 0x279   : > { %956 = dma.vmem_to_hbm [thread:$0]  (%p1570_p0), %s1504_s13, 1024, %s1502_s11, %s619_s22, %s1213_s28, %s1213_s28, %s1214_s9  }
 0x27a PF: > { %s647_s30 = sand.u32 1, %s1193_s18   ;;  %p1571_p7 = scmp.ne.s32.totalorder %s1561_s25, 0 }
 0x27b   : > { %p1572_p9 = scmp.ge.s32.totalorder %s1205_s21, 2  ;;  %s648_s17 = scalar_lea.sflag [#allocation4], %s647_s30 }
 0x27d   : > { %p970_p12 = pnand %p1572_p9, %p1571_p7 }
 0x27f   : > { %1188 = dma.done.wait (!%p970_p12), %s648_s17, 1024  }
 0x280   : > { %1190 = vsyncadd (!%p970_p12), %s648_s17, 4294966272  ;;  %p19_p1 = scmp.ge.s32.totalorder %s1361_s29, 4   ;;  %s1573_s18 = smov %s1197_s19 }
 0x281   : > { %s1574_s19 = smov %s1201_s20  ;;  %s1575_s20 = smov %s1377_s27 }
 0x282   : > { %s1576_s21 = smov %s1361_s29  ;;  %21 = sbr.rel (!%p19_p1) target bundleno = 6 (0x6), region = 93 }
 0x289   :  { %653 = vsyncpa [#allocation3], 1 }
 0x28a   :  { %655 = vsyncpa [#allocation3 + $0x1], 1 }
 0x28b   :  { %656 = vsyncpa [#allocation6], 1 }
 0x28c   :  { %657 = vsyncpa [#allocation4], 1 }
 0x28d   :  { %659 = vsyncpa [#allocation4 + $0x1], 1 }

</bundles_post_ra>
